<compile_context>
chip_gen: v7x
topology: tpu7x:2x2x1
jax: 0.10.0
libtpu: 0.0.40
codegen_flags: <defaults>
</compile_context>

<pallas_src>
import functools

import jax
import jax.numpy as jnp
from jax import lax
from jax.experimental import pallas as pl
from jax.experimental.pallas import tpu as pltpu

BN_EPS = 1e-5  # nn.BatchNorm2d default eps


# ---------------------------------------------------------------------------
# Kernel 1: BatchNorm2d training-mode statistics, streamed over (Bb, C, T)
# tiles with a Chan (mean, M2) merge.  Grid = (split, nb, nt); axis 0 is
# "parallel" (one partial-output slot per core), axes 1/2 are the sequential
# streaming axes on each core.
# ---------------------------------------------------------------------------
def bn_stats_kernel(x_ref, mean_ref, m2_ref, mean_sc, m2_sc, *, tile_count):
    b = pl.program_id(1)
    t = pl.program_id(2)
    step = b * pl.num_programs(2) + t                 # per-core sequential step

    x = x_ref[...].astype(jnp.float32)                # (Bb, C, T), upcast per tile
    m_t = jnp.mean(x, axis=(0, 2), keepdims=True)     # (1, C, 1) tile mean
    d = x - m_t
    ss_t = jnp.sum(d * d, axis=(0, 2), keepdims=True) # (1, C, 1) tile M2

    @pl.when(step == 0)
    def _():
        mean_sc[...] = jnp.zeros_like(mean_sc)
        m2_sc[...] = jnp.zeros_like(m2_sc)

    # Chan merge with the running accumulator; counts kept in f32 so the
    # arithmetic never overflows int32 for huge B*H*W.
    n = step.astype(jnp.float32) * tile_count         # elements merged so far
    frac = tile_count / (n + tile_count)
    delta = m_t - mean_sc[...]
    mean_sc[...] = mean_sc[...] + delta * frac
    m2_sc[...] = m2_sc[...] + ss_t + (delta * delta) * (n * frac)

    # Tiny per-core partial outputs; the value present at the core's last step
    # is what lands in HBM when the output block retires.
    mean_ref[...] = mean_sc[...]
    m2_ref[...] = m2_sc[...]


# ---------------------------------------------------------------------------
# Kernel 2: streaming per-channel affine  y = A[c]*x + B[c]  (native dtype in,
# lane-dense output tiles).
# ---------------------------------------------------------------------------
def affine_kernel(x_ref, a_ref, b_ref, o_ref):
    x = x_ref[...].astype(jnp.float32)                # (Bb, C, T)
    o_ref[...] = (x * a_ref[...] + b_ref[...]).astype(o_ref.dtype)


# ---------------------------------------------------------------------------
# Tiling helpers (generation-aware byte budget; no hard lane cap).
# ---------------------------------------------------------------------------
def _block_byte_budget():
    vmem = 128 * 1024 * 1024
    try:
        vmem = int(getattr(pltpu.get_tpu_info(), "vmem_capacity_bytes", vmem))
    except Exception:
        pass
    # ~4 MiB blocks on v7x (64 MiB VMEM), ~8 MiB on v5e/v6e (128 MiB VMEM).
    return int(min(max(vmem // 16, 2 * 1024 * 1024), 10 * 1024 * 1024))


def _choose_tiles(B, C, HW_pad, work_itemsize, budget, hw_tile=None,
                  batch_block=None):
    """Pick (T, Bb): lane tile (multiple of 128 dividing HW_pad) + batch block."""
    if hw_tile is not None:
        T = int(hw_tile)
    else:
        cap = max(128, (budget // max(C * work_itemsize, 1)) // 128 * 128)
        T = min(HW_pad, cap)
        T = max(128, (T // 128) * 128)
        while T > 128 and HW_pad % T != 0:
            T -= 128
        if HW_pad % T != 0:
            T = HW_pad
    assert HW_pad % T == 0, (HW_pad, T)

    if batch_block is not None:
        Bb = int(batch_block)
    else:
        Bb = 1
        if T == HW_pad:  # small C: span several batches so each step moves >=1 MiB
            blk = C * T * work_itemsize
            Bb = max(1, min(B, budget // max(blk, 1)))
            while Bb > 1 and B % Bb != 0:
                Bb -= 1
    assert B % Bb == 0, (B, Bb)
    return T, Bb


# ---------------------------------------------------------------------------
# Wrapper: PKIBlock forward (identity block/ffn, inference drop_path).
# ---------------------------------------------------------------------------
def pki_block_forward(x, bn1_gamma, bn1_beta, bn2_gamma, bn2_beta,
                      ls_gamma1, ls_gamma2, *,
                      hw_tile=None, batch_block=None, x_buffers=None):
    B, C, H, W = x.shape
    HW = H * W
    HW_pad = -(-HW // 128) * 128                      # lane-dense padding
    x_flat = x.reshape(B, C, HW)
    if HW_pad != HW:
        x_flat = jnp.pad(x_flat, ((0, 0), (0, 0), (0, HW_pad - HW)))

    itemsize = x_flat.dtype.itemsize
    work_itemsize = max(itemsize, 4)                  # in-kernel f32 working set
    budget = _block_byte_budget()
    vmem_limit = int(min(max(budget * 8, 32 * 1024 * 1024), 96 * 1024 * 1024))
    T, Bb = _choose_tiles(B, C, HW_pad, work_itemsize, budget,
                          hw_tile=hw_tile, batch_block=batch_block)
    nb, nt = B // Bb, HW_pad // T

    # --- kernel 1: per-channel batch stats, split across (up to) 2 cores ----
    if nb % 2 == 0:
        split, nb_i, nt_i = 2, nb // 2, nt
        x_map = lambda s, b, t: (s * nb_i + b, 0, t)
    elif nt % 2 == 0:
        split, nb_i, nt_i = 2, nb, nt // 2
        x_map = lambda s, b, t: (b, 0, s * nt_i + t)
    else:
        split, nb_i, nt_i = 1, nb, nt
        x_map = lambda s, b, t: (b, 0, t)
    tile_count = float(Bb * T)

    stats_bytes = int(B * C * HW_pad * itemsize + 2 * split * C * 4)
    mean_p, m2_p = pl.pallas_call(
        functools.partial(bn_stats_kernel, tile_count=tile_count),
        out_shape=(jax.ShapeDtypeStruct((split, C, 1), jnp.float32),
                   jax.ShapeDtypeStruct((split, C, 1), jnp.float32)),
        grid=(split, nb_i, nt_i),
        in_specs=[pl.BlockSpec((Bb, C, T), x_map)],
        out_specs=(pl.BlockSpec((1, C, 1), lambda s, b, t: (s, 0, 0)),
                   pl.BlockSpec((1, C, 1), lambda s, b, t: (s, 0, 0))),
        scratch_shapes=[pltpu.VMEM((1, C, 1), jnp.float32),
                        pltpu.VMEM((1, C, 1), jnp.float32)],
        compiler_params=pltpu.CompilerParams(
            dimension_semantics=("parallel", "arbitrary", "arbitrary"),
            vmem_limit_bytes=vmem_limit),
        cost_estimate=pl.CostEstimate(flops=int(3 * B * C * HW_pad),
                                      transcendentals=0,
                                      bytes_accessed=stats_bytes),
    )(x_flat)

    # --- wrapper: merge core partials, correct padding, fold all params -----
    f32 = jnp.float32
    mean_i = mean_p[:, :, 0]                           # (split, C)
    m2_i = m2_p[:, :, 0]
    per_core = float(B * HW_pad) / split               # equal counts per partial
    mean_pad = jnp.mean(mean_i, axis=0)                # padded-data mean, (C,)
    m2_pad = (jnp.sum(m2_i, axis=0)
              + per_core * jnp.sum((mean_i - mean_pad[None, :]) ** 2, axis=0))

    n_true = float(B * HW)
    n_pad = float(B * HW_pad)
    p_cnt = n_pad - n_true                             # zero-padded elements
    mean1 = mean_pad * (n_pad / n_true)
    m2_true = m2_pad - (mean_pad * mean_pad) * p_cnt * (n_pad / n_true)
    var1 = m2_true / n_true                            # biased batch variance

    bn1_g = bn1_gamma.astype(f32); bn1_b = bn1_beta.astype(f32)
    bn2_g = bn2_gamma.astype(f32); bn2_b = bn2_beta.astype(f32)
    g1 = ls_gamma1.astype(f32);    g2 = ls_gamma2.astype(f32)

    s1 = bn1_g * lax.rsqrt(var1 + BN_EPS)
    a1 = 1.0 + g1 * s1                                 # y1 = a1*x + b1
    b1 = g1 * (bn1_b - mean1 * s1)

    mean2 = a1 * mean1 + b1                            # exact: stage 1 is affine
    var2 = a1 * a1 * var1
    s2 = bn2_g * lax.rsqrt(var2 + BN_EPS)
    a2 = 1.0 + g2 * s2                                 # y2 = a2*y1 + b2
    b2 = g2 * (bn2_b - mean2 * s2)

    a_fold = (a2 * a1)[None, :, None]                  # (1, C, 1)
    b_fold = (a2 * b1 + b2)[None, :, None]             # (1, C, 1)

    # --- kernel 2: lane-dense streaming per-channel affine ------------------
    if x_buffers is not None:                          # optional v7x depth sweep
        x_spec = pl.BlockSpec((Bb, C, T), lambda b, t: (b, 0, t),
                              pipeline_mode=pl.Buffered(int(x_buffers)))
    else:
        x_spec = pl.BlockSpec((Bb, C, T), lambda b, t: (b, 0, t))
    apply_bytes = int(2 * B * C * HW_pad * itemsize + 2 * C * 4)
    out_flat = pl.pallas_call(
        affine_kernel,
        out_shape=jax.ShapeDtypeStruct((B, C, HW_pad), x_flat.dtype),
        grid=(nb, nt),
        in_specs=[x_spec,
                  pl.BlockSpec((1, C, 1), lambda b, t: (0, 0, 0)),
                  pl.BlockSpec((1, C, 1), lambda b, t: (0, 0, 0))],
        out_specs=pl.BlockSpec((Bb, C, T), lambda b, t: (b, 0, t)),
        compiler_params=pltpu.CompilerParams(
            dimension_semantics=("parallel", "parallel"),
            vmem_limit_bytes=vmem_limit),
        cost_estimate=pl.CostEstimate(flops=int(2 * B * C * HW_pad),
                                      transcendentals=0,
                                      bytes_accessed=apply_bytes),
    )(x_flat, a_fold, b_fold)

    if HW_pad != HW:
        out_flat = out_flat[:, :, :HW]
    return out_flat.reshape(B, C, H, W)


# ---------------------------------------------------------------------------
# Pure-JAX reference mirroring PKIBlock.forward (identity block/ffn, inference
# drop_path, training-mode BatchNorm batch statistics).
# ---------------------------------------------------------------------------
def _reference(x, bn1_gamma, bn1_beta, bn2_gamma, bn2_beta, ls_gamma1, ls_gamma2):
    x = x.astype(jnp.float32)

    def bn(v, g, b):
        m = jnp.mean(v, axis=(0, 2, 3), keepdims=True)
        var = jnp.mean((v - m) ** 2, axis=(0, 2, 3), keepdims=True)
        return ((v - m) * lax.rsqrt(var + BN_EPS) * g[None, :, None, None]
                + b[None, :, None, None])

    y1 = x + ls_gamma1[None, :, None, None] * bn(x, bn1_gamma, bn1_beta)
    y2 = y1 + ls_gamma2[None, :, None, None] * bn(y1, bn2_gamma, bn2_beta)
    return y2


if __name__ == "__main__":
    key = jax.random.PRNGKey(0)
    # in_channels = out_channels = hidden_channels = 32 (expansion=1.0,
    # _make_divisible(32, 8) == 32), add_identity path, layer_scale = 1.0.
    B, C, H, W = 2, 32, 16, 16
    kx, k1, k2, k3, k4, k5, k6 = jax.random.split(key, 7)

    x = jax.random.normal(kx, (B, C, H, W), dtype=jnp.float32)
    bn1_gamma = 1.0 + 0.1 * jax.random.normal(k1, (C,), dtype=jnp.float32)
    bn1_beta = 0.1 * jax.random.normal(k2, (C,), dtype=jnp.float32)
    bn2_gamma = 1.0 + 0.1 * jax.random.normal(k3, (C,), dtype=jnp.float32)
    bn2_beta = 0.1 * jax.random.normal(k4, (C,), dtype=jnp.float32)
    layer_scale = 1.0
    ls_gamma1 = layer_scale * (1.0 + 0.05 * jax.random.normal(k5, (C,), jnp.float32))
    ls_gamma2 = layer_scale * (1.0 + 0.05 * jax.random.normal(k6, (C,), jnp.float32))

    ref = _reference(x, bn1_gamma, bn1_beta, bn2_gamma, bn2_beta,
                     ls_gamma1, ls_gamma2)

    # 1) forced small tiles: exercises the streaming Chan accumulator, the
    #    2-slot core split of kernel 1 and the multi-tile apply kernel.
    out_small = pki_block_forward(x, bn1_gamma, bn1_beta, bn2_gamma, bn2_beta,
                                  ls_gamma1, ls_gamma2,
                                  hw_tile=128, batch_block=1)
    out_small = jax.block_until_ready(out_small)
    assert out_small.shape == (B, C, H, W)
    assert jnp.allclose(out_small, ref, atol=1e-4, rtol=1e-4)

    # 2) auto (generation-aware) tile selection.
    out_auto = pki_block_forward(x, bn1_gamma, bn1_beta, bn2_gamma, bn2_beta,
                                 ls_gamma1, ls_gamma2)
    out_auto = jax.block_until_ready(out_auto)
    assert jnp.allclose(out_auto, ref, atol=1e-4, rtol=1e-4)

    # 3) native-bf16 stream with HW not a multiple of 128 (exercises the
    #    lane-padding + analytic stats-correction path).
    Hb = Wb = 14
    xb = jax.random.normal(kx, (B, C, Hb, Wb), jnp.float32).astype(jnp.bfloat16)
    ref_b = _reference(xb.astype(jnp.float32), bn1_gamma, bn1_beta,
                       bn2_gamma, bn2_beta, ls_gamma1, ls_gamma2)
    out_b = pki_block_forward(xb, bn1_gamma, bn1_beta, bn2_gamma, bn2_beta,
                              ls_gamma1, ls_gamma2)
    out_b = jax.block_until_ready(out_b)
    assert out_b.shape == (B, C, Hb, Wb)
    assert jnp.allclose(out_b.astype(jnp.float32), ref_b, atol=5e-2, rtol=5e-2)

    print("KERNEL_OK")
</pallas_src>

<mosaic_0001>
module attributes {stable_mosaic.version = 11 : i64} {
  func.func @bn_stats_kernel(%arg0: i32, %arg1: i32, %arg2: i32, %arg3: memref<1x32x128xf32, #tpu.memory_space<vmem>>, %arg4: memref<1x32x1xf32, #tpu.memory_space<vmem>>, %arg5: memref<1x32x1xf32, #tpu.memory_space<vmem>>, %arg6: memref<1x32x1xf32, #tpu.memory_space<vmem>>, %arg7: memref<1x32x1xf32, #tpu.memory_space<vmem>>) attributes {dimension_semantics = [#tpu.dimension_semantics<parallel>, #tpu.dimension_semantics<arbitrary>, #tpu.dimension_semantics<arbitrary>], iteration_bounds = array<i64: 2, 1, 2>, scalar_prefetch = 0 : i64, scratch_operands = 2 : i64, tpu.core_type = #tpu.core_type<tc>, window_params = [{transform_indices = @transform_0, window_bounds = array<i64: 1, 32, 128>}, {transform_indices = @transform_1, window_bounds = array<i64: 1, 32, 1>}, {transform_indices = @transform_2, window_bounds = array<i64: 1, 32, 1>}]} {
    %c2_i32 = arith.constant 2 : i32
    %0 = arith.muli %arg1, %c2_i32 : i32
    %1 = arith.addi %0, %arg2 : i32
    %c0 = arith.constant 0 : index
    %c0_0 = arith.constant 0 : index
    %c0_1 = arith.constant 0 : index
    %2 = vector.load %arg3[%c0, %c0_0, %c0_1] : memref<1x32x128xf32, #tpu.memory_space<vmem>>, vector<1x32x128xf32>
    %cst = arith.constant dense<0.000000e+00> : vector<32xf32>
    %3 = vector.multi_reduction <add>, %2, %cst [0, 2] : vector<1x32x128xf32> to vector<32xf32>
    %4 = vector.shape_cast %3 : vector<32xf32> to vector<1x32x1xf32>
    %cst_2 = arith.constant 1.280000e+02 : f32
    %5 = vector.broadcast %cst_2 : f32 to vector<1x32x1xf32>
    %6 = arith.divf %4, %5 : vector<1x32x1xf32>
    %7 = vector.broadcast %6 : vector<1x32x1xf32> to vector<1x32x128xf32>
    %8 = arith.subf %2, %7 : vector<1x32x128xf32>
    %9 = arith.mulf %8, %8 : vector<1x32x128xf32>
    %cst_3 = arith.constant dense<0.000000e+00> : vector<32xf32>
    %10 = vector.multi_reduction <add>, %9, %cst_3 [0, 2] : vector<1x32x128xf32> to vector<32xf32>
    %11 = vector.shape_cast %10 : vector<32xf32> to vector<1x32x1xf32>
    %c0_i32 = arith.constant 0 : i32
    %12 = arith.cmpi eq, %1, %c0_i32 : i32
    %13 = arith.extui %12 : i1 to i32
    %c0_i32_4 = arith.constant 0 : i32
    %14 = arith.cmpi ne, %13, %c0_i32_4 : i32
    scf.if %14 {
      %cst_35 = arith.constant 0.000000e+00 : f32
      %38 = vector.broadcast %cst_35 : f32 to vector<1x32x1xf32>
      %c0_36 = arith.constant 0 : index
      %c0_37 = arith.constant 0 : index
      %c0_38 = arith.constant 0 : index
      %39 = vector.load %arg6[%c0_36, %c0_37, %c0_38] : memref<1x32x1xf32, #tpu.memory_space<vmem>>, vector<1x32x1xf32>
      tpu.vector_store %arg6[%c0_36, %c0_37, %c0_38], %38 {strides = array<i32>} : memref<1x32x1xf32, #tpu.memory_space<vmem>>, vector<1x32x1xf32>,
      %cst_39 = arith.constant 0.000000e+00 : f32
      %40 = vector.broadcast %cst_39 : f32 to vector<1x32x1xf32>
      %c0_40 = arith.constant 0 : index
      %c0_41 = arith.constant 0 : index
      %c0_42 = arith.constant 0 : index
      %41 = vector.load %arg7[%c0_40, %c0_41, %c0_42] : memref<1x32x1xf32, #tpu.memory_space<vmem>>, vector<1x32x1xf32>
      tpu.vector_store %arg7[%c0_40, %c0_41, %c0_42], %40 {strides = array<i32>} : memref<1x32x1xf32, #tpu.memory_space<vmem>>, vector<1x32x1xf32>,
    } else {
    }
    %15 = arith.sitofp %1 : i32 to f32
    %cst_5 = arith.constant 1.280000e+02 : f32
    %16 = arith.mulf %15, %cst_5 : f32
    %cst_6 = arith.constant 1.280000e+02 : f32
    %17 = arith.addf %16, %cst_6 : f32
    %cst_7 = arith.constant 1.280000e+02 : f32
    %18 = arith.divf %cst_7, %17 : f32
    %c0_8 = arith.constant 0 : index
    %c0_9 = arith.constant 0 : index
    %c0_10 = arith.constant 0 : index
    %19 = vector.load %arg6[%c0_8, %c0_9, %c0_10] : memref<1x32x1xf32, #tpu.memory_space<vmem>>, vector<1x32x1xf32>
    %20 = arith.subf %6, %19 : vector<1x32x1xf32>
    %c0_11 = arith.constant 0 : index
    %c0_12 = arith.constant 0 : index
    %c0_13 = arith.constant 0 : index
    %21 = vector.load %arg6[%c0_11, %c0_12, %c0_13] : memref<1x32x1xf32, #tpu.memory_space<vmem>>, vector<1x32x1xf32>
    %22 = vector.broadcast %18 : f32 to vector<1x32x1xf32>
    %23 = arith.mulf %20, %22 : vector<1x32x1xf32>
    %24 = arith.addf %21, %23 : vector<1x32x1xf32>
    %c0_14 = arith.constant 0 : index
    %c0_15 = arith.constant 0 : index
    %c0_16 = arith.constant 0 : index
    %25 = vector.load %arg6[%c0_14, %c0_15, %c0_16] : memref<1x32x1xf32, #tpu.memory_space<vmem>>, vector<1x32x1xf32>
    tpu.vector_store %arg6[%c0_14, %c0_15, %c0_16], %24 {strides = array<i32>} : memref<1x32x1xf32, #tpu.memory_space<vmem>>, vector<1x32x1xf32>,
    %c0_17 = arith.constant 0 : index
    %c0_18 = arith.constant 0 : index
    %c0_19 = arith.constant 0 : index
    %26 = vector.load %arg7[%c0_17, %c0_18, %c0_19] : memref<1x32x1xf32, #tpu.memory_space<vmem>>, vector<1x32x1xf32>
    %27 = arith.addf %26, %11 : vector<1x32x1xf32>
    %28 = arith.mulf %20, %20 : vector<1x32x1xf32>
    %29 = arith.mulf %16, %18 : f32
    %30 = vector.broadcast %29 : f32 to vector<1x32x1xf32>
    %31 = arith.mulf %28, %30 : vector<1x32x1xf32>
    %32 = arith.addf %27, %31 : vector<1x32x1xf32>
    %c0_20 = arith.constant 0 : index
    %c0_21 = arith.constant 0 : index
    %c0_22 = arith.constant 0 : index
    %33 = vector.load %arg7[%c0_20, %c0_21, %c0_22] : memref<1x32x1xf32, #tpu.memory_space<vmem>>, vector<1x32x1xf32>
    tpu.vector_store %arg7[%c0_20, %c0_21, %c0_22], %32 {strides = array<i32>} : memref<1x32x1xf32, #tpu.memory_space<vmem>>, vector<1x32x1xf32>,
    %c0_23 = arith.constant 0 : index
    %c0_24 = arith.constant 0 : index
    %c0_25 = arith.constant 0 : index
    %34 = vector.load %arg6[%c0_23, %c0_24, %c0_25] : memref<1x32x1xf32, #tpu.memory_space<vmem>>, vector<1x32x1xf32>
    %c0_26 = arith.constant 0 : index
    %c0_27 = arith.constant 0 : index
    %c0_28 = arith.constant 0 : index
    %35 = vector.load %arg4[%c0_26, %c0_27, %c0_28] : memref<1x32x1xf32, #tpu.memory_space<vmem>>, vector<1x32x1xf32>
    tpu.vector_store %arg4[%c0_26, %c0_27, %c0_28], %34 {strides = array<i32>} : memref<1x32x1xf32, #tpu.memory_space<vmem>>, vector<1x32x1xf32>,
    %c0_29 = arith.constant 0 : index
    %c0_30 = arith.constant 0 : index
    %c0_31 = arith.constant 0 : index
    %36 = vector.load %arg7[%c0_29, %c0_30, %c0_31] : memref<1x32x1xf32, #tpu.memory_space<vmem>>, vector<1x32x1xf32>
    %c0_32 = arith.constant 0 : index
    %c0_33 = arith.constant 0 : index
    %c0_34 = arith.constant 0 : index
    %37 = vector.load %arg5[%c0_32, %c0_33, %c0_34] : memref<1x32x1xf32, #tpu.memory_space<vmem>>, vector<1x32x1xf32>
    tpu.vector_store %arg5[%c0_32, %c0_33, %c0_34], %36 {strides = array<i32>} : memref<1x32x1xf32, #tpu.memory_space<vmem>>, vector<1x32x1xf32>,
    return
  }
  func.func @transform_0(%arg0: i32, %arg1: i32, %arg2: i32) -> (i32, i32, i32) {
    %c1_i32 = arith.constant 1 : i32
    %0 = arith.muli %arg0, %c1_i32 : i32
    %1 = arith.addi %0, %arg1 : i32
    %c0_i32 = arith.constant 0 : i32
    %c0_i32_0 = arith.constant 0 : i32
    return %1, %c0_i32, %arg2 : i32, i32, i32
  }
  func.func @transform_1(%arg0: i32, %arg1: i32, %arg2: i32) -> (i32, i32, i32) {
    %c0_i32 = arith.constant 0 : i32
    %c0_i32_0 = arith.constant 0 : i32
    %c0_i32_1 = arith.constant 0 : i32
    return %arg0, %c0_i32, %c0_i32_0 : i32, i32, i32
  }
  func.func @transform_2(%arg0: i32, %arg1: i32, %arg2: i32) -> (i32, i32, i32) {
    %c0_i32 = arith.constant 0 : i32
    %c0_i32_0 = arith.constant 0 : i32
    %c0_i32_1 = arith.constant 0 : i32
    return %arg0, %c0_i32, %c0_i32_0 : i32, i32, i32
  }
}

</mosaic_0001>

<bundles_post_ra>
// kernel: tpu_custom_call.1
= control target key start
LH: loop header
LB: loop body
LE: loop exit
PB: predicated region body
PF: predicated region fallthrough
CT: control target
= control target key end

     0   :  { %8 = vsyncpa [#allocation5], 0  ;;  %s1116_s0 = inlined_call_operand.hbm [shape: f32[2,32,256], index: 0, kind: input, shape index: {}]   ;;  %s1117_s1 = inlined_call_operand.hbm [shape: f32[2,32,1], index: 1, kind: output, shape index: {0}]   ;;  %s1118_s2 = inlined_call_operand.hbm [shape: f32[2,32,1], index: 2, kind: output, shape index: {1}]  }
   0x1   :  { %10 = vsyncpa [#allocation5 + $0x1], 0 }
   0x2   :  { %11 = vsyncpa [#allocation6], 0 }
   0x3   :  { %13 = vsyncpa [#allocation6 + $0x1], 0 }
   0x4   :  { %14 = vsyncpa [#allocation9], 0 }
   0x5   :  { %16 = vsyncpa [#allocation9 + $0x1], 0  ;;  %s824_s9 = smov 0   ;;  %s826_s10 = smov 0  }
   0x6   :  { %s828_s11 = smov 0   ;;  %s830_s12 = smov 0  }
   0x7   :  { %s832_s13 = smov 0   ;;  %s834_s14 = smov 0  }
   0x8   :  { %s836_s15 = smov 0   ;;  %s838_s16 = smov 0  }
   0x9   :  { %s840_s17 = smov 0   ;;  %s842_s18 = smov 0  }
   0xa   :  { %s844_s19 = smov 0  }
   0xb LB: > { %s475_s20 = sadd.s32 4294967295, %s798_s19   ;;  %s476_s21 = sadd.s32 4294967294, %s798_s19   ;;  %s798_s19 = sphi %s844_s19, %s22_s19   ;;  %s794_s18 = sphi %s842_s18, %s1139_s18   ;;  %s790_s17 = sphi %s840_s17, %s1138_s17   ;;  %s786_s16 = sphi %s838_s16, %s1137_s16   ;;  %s782_s15 = sphi %s836_s15, %s1136_s15   ;;  %s778_s14 = sphi %s834_s14, %s1135_s14   ;;  %s774_s13 = sphi %s832_s13, %s1134_s13   ;;  %s770_s12 = sphi %s830_s12, %s1133_s12   ;;  %s766_s11 = sphi %s828_s11, %s1132_s11   ;;  %s762_s10 = sphi %s826_s10, %s1131_s10   ;;  %s758_s9 = sphi %s824_s9, %s1130_s9  }
   0xc   : > { %s34_s22 = sadd.s32 1, %s790_s17  ;;  %s41_s23 = sadd.s32 1, %s794_s18 }
   0xd   : > { %p35_p0 = scmp.ge.s32.totalorder %s34_s22, 2  ;;  %s52_s24 = sadd.s32 1, %s778_s14 }
   0xe   : > { %p59_p1 = scmp.ne.s32.totalorder %s778_s14, %s774_s13  ;;  %p60_p2 = scmp.eq.s32.totalorder %s798_s19, 0 }
   0xf   : > { %s1141_s22 = smov (%p35_p0, %s34_s22), 0  ;;  %s1143_s23 = smov (!%p35_p0, %s41_s23), %s794_s18 }
  0x10   : > { %s48_s25 = ssub.s32 %s790_s17, %s1141_s22  ;;  %p890_p3 = por %p60_p2, %p59_p1 }
  0x11   : > { %p43_p4 = scmp.ge.s32.totalorder %s1143_s23, 2  ;;  %p65_p5 = scmp.ne.s32.totalorder %s774_s13, %s770_s12 }
  0x12   : > { %p66_p6 = scmp.eq.s32.totalorder %s475_s20, 0  ;;  %s78_s27 = sadd.s32 1, %s766_s11 }
  0x13   : > { %s1145_s23 = smov (%p43_p4, %s1143_s23), 0  ;;  %p88_p8 = scmp.ne.s32.totalorder %s766_s11, %s762_s10 }
  0x14   : > { %1122 = sst [smem:[#allocation13_spill]] %s1145_s23  ;;  %p898_p7 = por %p66_p6, %p65_p5 }
  0x15   : > { %s47_s29 = ssub.s32 %s794_s18, %s1145_s23  ;;  %p89_p9 = scmp.eq.s32.totalorder %s475_s20, 3 }
  0x16   : > { %s49_s30 = sor.u32 %s48_s25, %s47_s29  ;;  %p76_p10 = scmp.eq.s32.totalorder %s47_s29, 0 }
  0x17   : > { %p50_p11 = scmp.eq.s32.totalorder %s49_s30, 0  ;;  %p906_p12 = por %p89_p9, %p88_p8 }
  0x18   : > { %s911_s4 = scalar_select %p76_p10, %s766_s11, %s78_s27  }
  0x19   : > { %s1124_s3 = scalar_select %p906_p12, 1, 0 }
  0x1a   : > { %s914_s5 = scalar_select %p50_p11, %s778_s14, %s52_s24  }
  0x1b   : > { %p94_p13 = scmp.ne.s32.totalorder %s762_s10, %s758_s9  ;;  %p95_p0 = scmp.eq.s32.totalorder %s476_s21, 3 }
  0x1c   : > { %p516_p1 = scmp.lt.s32.totalorder %s798_s19, 4  ;;  %s141_s7 = sand.u32 1, %s778_s14  }
  0x1d   : > { %p919_p2 = por %p95_p0, %p94_p13  ;;  %s479_s8 = sshll.u32 %s141_s7, 5 }
  0x1e   : > { %s480_s12 = sshll.u32 %s794_s18, 3  ;;  %s145_s25 = scalar_lea.vmem [#allocation4], %s479_s8 }
  0x1f   : > { %s1125_s6 = scalar_select %p919_p2, 1, 0 }
  0x20   : > { %s151_s20 = sadd.s32 %s790_s17, %s480_s12  ;;  %s154_s29 = sshll.u32 %s145_s25, 4  ;;  %s926_s29 = int_to_ptr.vmem [resolvable:$true] %s154_s29 }
  0x21   : > { %s481_s30 = sshll.u32 %s151_s20, 7  ;;  %p935_p4 = pnand %p516_p1, %p890_p3 }
  0x22   : > { %s931_s24 = scalar_lea.hbm %s1116_s0, %s481_s30  ;;  %s939_s8 = scalar_lea.sflag [#allocation5], %s141_s7 }
  0x23   : > { %s614_s12 = scalar_lea.hbm %s931_s24, 512  ;;  %p616_p6 = pneg %p935_p4 }
  0x24   : > { %p615_p5 = scmp.ne.s32.totalorder %s931_s24, %s614_s12  ;;  %s619_s20 = scalar_lea.hbm %s1116_s0, 2048 }
  0x25   : > { %p620_p3 = scmp.lt.u32.totalorder %s931_s24, %s1116_s0  ;;  %p621_p10 = scmp.lt.u32.totalorder %s619_s20, %s614_s12 }
  0x26   : > { %p617_p8 = pnand %p616_p6, %p615_p5  ;;  %p623_p13 = scmp.lt.u32.totalorder %s614_s12, %s931_s24 }
  0x27   : > { %p622_p11 = por %p621_p10, %p620_p3 }
  0x28   : > { %p618_p9 = pneg %p617_p8 }
  0x29   : > { %p624_p0 = por %p623_p13, %p622_p11 }
  0x2b   : > { %p625_p1 = pnand %p624_p0, %p618_p9 }
  0x2d   : > { %628 = shalt.err (!%p625_p1)
}
  0x2e   : > { %s629_s7 = scalar_lea.vmem %s926_s29, 512  ;;  %s800_s27 = smov [#allocation4]  }
  0x2f   : > { %p630_p5 = scmp.ne.s32.totalorder %s926_s29, %s629_s7  ;;  %s634_s23 = sshll.u32 %s800_s27, 4  ;;  %s635_s23 = int_to_ptr.vmem [resolvable:$false] %s634_s23 }
  0x30   : > { %s636_s26 = scalar_lea.vmem %s635_s23, 1024  ;;  %p637_p12 = scmp.lt.s32.totalorder %s926_s29, %s635_s23 }
  0x31   : > { %p632_p8 = pnand %p630_p5, %p616_p6  ;;  %p638_p3 = scmp.lt.s32.totalorder %s636_s26, %s629_s7 }
  0x33   : > { %p633_p2 = pneg %p632_p8  ;;  %p639_p10 = por %p638_p3, %p637_p12 }
  0x35   : > { %p640_p11 = pnand %p639_p10, %p633_p2 }
  0x37   : > { %643 = shalt.err (!%p640_p11)
}
  0x38   : > { %s801_s12 = smov 256   ;;  %s802_s20 = smov 128  }
  0x39   : > { %s803_s25 = smov 8   ;;  %p482_p6 = scmp.ge.s32.totalorder %s798_s19, 1 }
  0x3a   : > { %508 = dma.hbm_to_vmem [thread:$0]  (!%p935_p4), %s931_s24, 512, %s926_s29, %s939_s8, %s801_s12, %s802_s20, %s803_s25  }
  0x3b   : > { %p162_p9 = scmp.lt.s32.totalorder %s798_s19, 5 }
  0x3d   : > { %p163_p13 = pnand %p482_p6, %p162_p9 }
  0x3e   : > { %s168_s30 = sand.u32 (!%p163_p13), 1, %s774_s13  }
  0x3f   : > { %166 = sbr.rel (%p163_p13) target bundleno = 492 (0x1ec), region = 24  ;;  %s483_s7 = sshll.u32 (!%p163_p13), %s168_s30, 5 }
  0x40   : > { %s169_s27 = scalar_lea.sflag (!%p163_p13), [#allocation5], %s168_s30  ;;  %s172_s23 = scalar_lea.vmem (!%p163_p13), [#allocation4], %s483_s7 }
  0x46   : > { %745 = dma.done.wait (%p898_p7), %s169_s27, 512  }
  0x47   : > { %747 = vsyncadd (%p898_p7), %s169_s27, 4294966784  ;;  %v201_v0 = vld [vmem:[%s172_s23] sm:$0xff]  ;;  %v203_v1 = vld [vmem:[%s172_s23 + $0x10] sm:$0xff]  ;;  %s975_s28 = sand.u32 1, %s762_s10   ;;  %p486_p7 = scmp.ne.s32.totalorder %s782_s15, 0 }
  0x48   : > { %205 = vadd.xlane.f32.xlu0 %v201_v0  ;;  %209 = vadd.xlane.f32.xlu1 %v203_v1  ;;  %v202_v2 = vld [vmem:[%s172_s23 + $0x8] sm:$0xff]  ;;  %v204_v3 = vld [vmem:[%s172_s23 + $0x18] sm:$0xff]  ;;  %s484_s29 = sshll.u32 %s975_s28, 5  ;;  %vm238_vm0 = vcmask (!%p486_p7), 7168   ;;  %v804_v24 = vmov (!%p486_p7), 0.0  }
  0x49   : > { %s978_s24 = scalar_lea.vmem [#allocation7], %s484_s29  ;;  %s980_s21 = scalar_lea.vmem [#allocation8], %s484_s29  ;;  %239 = vst.msk [vmem:[#allocation2] sm:$0xff] (!%p486_p7), %vm238_vm0, %v804_v24  ;;  %240 = vst.msk [vmem:[#allocation2 + $0x8] sm:$0xff] (!%p486_p7), %vm238_vm0, %v804_v24 }
  0x4a   : > { %241 = vst.msk [vmem:[#allocation2 + $0x10] sm:$0xff] (!%p486_p7), %vm238_vm0, %v804_v24  ;;  %242 = vst.msk [vmem:[#allocation2 + $0x18] sm:$0xff] (!%p486_p7), %vm238_vm0, %v804_v24 }
  0x4b   : > { %243 = vst.msk [vmem:[#allocation3] sm:$0xff] (!%p486_p7), %vm238_vm0, %v804_v24  ;;  %244 = vst.msk [vmem:[#allocation3 + $0x8] sm:$0xff] (!%p486_p7), %vm238_vm0, %v804_v24 }
  0x4c   : > { %207 = vadd.xlane.f32.xlu0 %v202_v2  ;;  %211 = vadd.xlane.f32.xlu1 %v204_v3  ;;  %245 = vst.msk [vmem:[#allocation3 + $0x10] sm:$0xff] (!%p486_p7), %vm238_vm0, %v804_v24  ;;  %246 = vst.msk [vmem:[#allocation3 + $0x18] sm:$0xff] (!%p486_p7), %vm238_vm0, %v804_v24 }
  0xd5   : > { %v206_v4 = vpop.xlane.xlu0 %205  ;;  %v210_v5 = vpop.xlane.xlu1 %209 }
  0xd6   : > { %v214_v6 = vmul.f32 0.0078125, %v206_v4  ;;  %v216_v7 = vmul.f32 0.0078125, %v210_v5 }
  0xd8   : > { %v218_v8 = vsub.f32 %v201_v0, %v214_v6  ;;  %v220_v9 = vsub.f32 %v203_v1, %v216_v7 }
  0xd9   : > { %v208_v10 = vpop.xlane.xlu0 %207  ;;  %v212_v11 = vpop.xlane.xlu1 %211 }
  0xda   : > { %v215_v12 = vmul.f32 0.0078125, %v208_v10  ;;  %v222_v13 = vmul.f32 %v218_v8, %v218_v8  ;;  %v217_v14 = vmul.f32 0.0078125, %v212_v11  ;;  %v224_v15 = vmul.f32 %v220_v9, %v220_v9 }
  0xdc   : > { %226 = vadd.xlane.f32.xlu0 %v222_v13  ;;  %v219_v16 = vsub.f32 %v202_v2, %v215_v12  ;;  %v221_v17 = vsub.f32 %v204_v3, %v217_v14 }
  0xde   : > { %v223_v18 = vmul.f32 %v219_v16, %v219_v16  ;;  %v225_v19 = vmul.f32 %v221_v17, %v221_v17 }
  0xe0   : > { %230 = vadd.xlane.f32.xlu0 %v224_v15  ;;  %228 = vadd.xlane.f32.xlu1 %v223_v18 }
  0xe4   : > { %232 = vadd.xlane.f32.xlu1 %v225_v19 }
 0x169   : > { %v227_v20 = vpop.xlane.xlu0 %226 }
 0x16b   : > { %237 = sbr.rel (%p486_p7) target bundleno = 370 (0x172), region = 32 }
 0x16d   : > { %v229_v21 = vpop.xlane.xlu1 %228  ;;  %v231_v22 = vpop.xlane.xlu0 %230 }
 0x171   : > { %v233_v23 = vpop.xlane.xlu1 %232 }
 0x172 PF: > { %s247_s8 = scvt.s32.f32 %s782_s15  ;;  %v254_v27 = vld [vmem:[#allocation2] sm:$0xff]  ;;  %v255_v28 = vld [vmem:[#allocation2 + $0x8] sm:$0xff]  ;;  %v256_v29 = vld [vmem:[#allocation2 + $0x10] sm:$0xff]  ;;  %vm271_vm1 = vcmask 7168   ;;  %s495_s30 = sshll.u32 %s786_s16, 9 }
 0x173   : > { %v257_v30 = vld [vmem:[#allocation2 + $0x18] sm:$0xff]  ;;  %v258_v31 = vsub.f32 %v214_v6, %v254_v27  ;;  %v259_v32 = vsub.f32 %v215_v12, %v255_v28  ;;  %v260_v33 = vsub.f32 %v216_v7, %v256_v29  ;;  %v276_v35 = vld [vmem:[#allocation3] sm:$0xff]  ;;  %v277_v36 = vld [vmem:[#allocation3 + $0x8] sm:$0xff]  ;;  %s337_s7 = sshll.u32 %s978_s24, 4  ;;  %s997_s29 = scalar_lea.hbm %s1117_s1, %s495_s30  ;;  %s999_s7 = int_to_ptr.vmem [resolvable:$true] %s337_s7 }
 0x174   : > { %s248_s26 = smul.f32 128.0, %s247_s8  ;;  %v261_v34 = vsub.f32 %v217_v14, %v257_v30  ;;  %v278_v37 = vld [vmem:[#allocation3 + $0x10] sm:$0xff]  ;;  %v279_v38 = vld [vmem:[#allocation3 + $0x18] sm:$0xff]  ;;  %v280_v39 = vadd.f32 %v276_v35, %v227_v20  ;;  %v281_v49 = vadd.f32 %v277_v36, %v229_v21  ;;  %s353_s16 = sshll.u32 %s980_s21, 4  ;;  %s1015_s16 = int_to_ptr.vmem [resolvable:$true] %s353_s16 }
 0x175   : > { %v284_v40 = vmul.f32 %v258_v31, %v258_v31  ;;  %v285_v42 = vmul.f32 %v259_v32, %v259_v32  ;;  %v286_v43 = vmul.f32 %v260_v33, %v260_v33  ;;  %v282_v50 = vadd.f32 %v278_v37, %v231_v22  ;;  %p1127_p2 = scmp.ne.s32.totalorder %s1124_s3, 0 }
 0x176   : > { %s249_s12 = sadd.f32 128.0, %s248_s26  ;;  %v287_v44 = vmul.f32 %v261_v34, %v261_v34  ;;  %v283_v51 = vadd.f32 %v279_v38, %v233_v23 }
 0x178   : > { %v250_v25 = vstv %s249_s12  ;;  %s1013_s12 = scalar_lea.hbm %s1118_s2, %s495_s30 }
 0x179   : > { %612 = vrcp.f32 %v250_v25 }
 0x183   : > { %v613_v26 = vpop.eup %612 }
 0x184   : > { %497 = vpush %v613_v26 }
 0x1b5   : > { %s498_s20 = spop %497 }
 0x1b6   : > { %s253_s25 = smul.f32 128.0, %s498_s20  ;;  %s319_s20 = scalar_lea.sflag [#allocation6], %s975_s28 }
 0x1b8   : > { %v262_v41 = vstv %s253_s25  ;;  %s288_s15 = smul.f32 %s253_s25, %s248_s26  ;;  %s644_s25 = scalar_lea.vmem %s999_s7, 512 }
 0x1b9   : > { %v263_v45 = vmul.f32 %v262_v41, %v258_v31  ;;  %v264_v46 = vmul.f32 %v262_v41, %v259_v32  ;;  %v265_v47 = vmul.f32 %v262_v41, %v260_v33  ;;  %v266_v48 = vmul.f32 %v262_v41, %v261_v34  ;;  %p645_p12 = scmp.ne.s32.totalorder %s999_s7, %s644_s25 }
 0x1ba   : > { %v289_v52 = vstv %s288_s15  ;;  %s805_s15 = smov [#allocation7]  }
 0x1bb   : > { %v267_v53 = vadd.f32 %v263_v45, %v254_v27  ;;  %v268_v54 = vadd.f32 %v264_v46, %v255_v28  ;;  %v269_v55 = vadd.f32 %v265_v47, %v256_v29  ;;  %v270_v56 = vadd.f32 %v266_v48, %v257_v30  ;;  %p646_p4 = pnand %p645_p12, %p1127_p2  ;;  %s648_s27 = sshll.u32 %s805_s15, 4  ;;  %s649_s27 = int_to_ptr.vmem [resolvable:$false] %s648_s27 }
 0x1bc   : > { %v290_v57 = vmul.f32 %v289_v52, %v284_v40  ;;  %v291_v58 = vmul.f32 %v289_v52, %v285_v42  ;;  %v292_v59 = vmul.f32 %v289_v52, %v286_v43  ;;  %v293_v60 = vmul.f32 %v289_v52, %v287_v44  ;;  %s650_s23 = scalar_lea.vmem %s649_s27, 1024  ;;  %p651_p1 = scmp.lt.s32.totalorder %s999_s7, %s649_s27 }
 0x1bd   : > { %272 = vst.msk [vmem:[#allocation2] sm:$0xff] %vm271_vm1, %v267_v53  ;;  %273 = vst.msk [vmem:[#allocation2 + $0x8] sm:$0xff] %vm271_vm1, %v268_v54  ;;  %p647_p0 = pneg %p646_p4  ;;  %p652_p5 = scmp.lt.s32.totalorder %s650_s23, %s644_s25 }
 0x1be   : > { %274 = vst.msk [vmem:[#allocation2 + $0x10] sm:$0xff] %vm271_vm1, %v269_v55  ;;  %275 = vst.msk [vmem:[#allocation2 + $0x18] sm:$0xff] %vm271_vm1, %v270_v56  ;;  %v294_v61 = vadd.f32 %v290_v57, %v280_v39  ;;  %v295_v62 = vadd.f32 %v291_v58, %v281_v49  ;;  %v296_v63 = vadd.f32 %v292_v59, %v282_v50 }
 0x1bf   : > { %v297_v0 = vadd.f32 %v293_v60, %v283_v51  ;;  %p653_p8 = por %p652_p5, %p651_p1 }
 0x1c0   : > { %298 = vst.msk [vmem:[#allocation3] sm:$0xff] %vm271_vm1, %v294_v61  ;;  %299 = vst.msk [vmem:[#allocation3 + $0x8] sm:$0xff] %vm271_vm1, %v295_v62 }
 0x1c1   : > { %300 = vst.msk [vmem:[#allocation3 + $0x10] sm:$0xff] %vm271_vm1, %v296_v63  ;;  %301 = vst.msk [vmem:[#allocation3 + $0x18] sm:$0xff] %vm271_vm1, %v297_v0  ;;  %p654_p3 = pnand %p653_p8, %p647_p0 }
 0x1c4   : > { %v302_v1 = vld [vmem:[#allocation2] sm:$0xff]  ;;  %v303_v2 = vld [vmem:[#allocation2 + $0x8] sm:$0xff] }
 0x1c5   : > { %v304_v3 = vld [vmem:[#allocation2 + $0x10] sm:$0xff]  ;;  %v305_v4 = vld [vmem:[#allocation2 + $0x18] sm:$0xff]  ;;  %306 = vst.msk [vmem:[%s978_s24] sm:$0xff] %vm271_vm1, %v302_v1  ;;  %307 = vst.msk [vmem:[%s978_s24 + $0x8] sm:$0xff] %vm271_vm1, %v303_v2 }
 0x1c6   : > { %308 = vst.msk [vmem:[%s978_s24 + $0x10] sm:$0xff] %vm271_vm1, %v304_v3  ;;  %309 = vst.msk [vmem:[%s978_s24 + $0x18] sm:$0xff] %vm271_vm1, %v305_v4 }
 0x1c7   : > { %657 = shalt.err (!%p654_p3)
}
 0x1c8   : > { %s658_s24 = scalar_lea.hbm %s997_s29, 512  ;;  %s662_s26 = scalar_lea.hbm %s1117_s1, 1024 }
 0x1c9   : > { %p659_p10 = scmp.ne.s32.totalorder %s997_s29, %s658_s24  ;;  %p663_p9 = scmp.lt.u32.totalorder %s997_s29, %s1117_s1 }
 0x1ca   : > { %p664_p13 = scmp.lt.u32.totalorder %s662_s26, %s658_s24  ;;  %p666_p12 = scmp.lt.u32.totalorder %s658_s24, %s997_s29 }
 0x1cb   : > { %p660_p11 = pnand %p659_p10, %p1127_p2 }
 0x1cc   : > { %p665_p7 = por %p664_p13, %p663_p9 }
 0x1cd   : > { %p661_p6 = pneg %p660_p11 }
 0x1ce   : > { %p667_p4 = por %p666_p12, %p665_p7 }
 0x1d0   : > { %p668_p0 = pnand %p667_p4, %p661_p6 }
 0x1d2   : > { %671 = shalt.err (!%p668_p0)
}
 0x1d3   : > { %s806_s25 = smov 128   ;;  %s807_s23 = smov 8   ;;  %v310_v5 = vld [vmem:[#allocation3] sm:$0xff]  ;;  %v311_v6 = vld [vmem:[#allocation3 + $0x8] sm:$0xff]  ;;  %v312_v7 = vld [vmem:[#allocation3 + $0x10] sm:$0xff] }
 0x1d4   : > { %501 = dma.vmem_to_hbm [thread:$0]  (%p1127_p2), %s999_s7, 512, %s997_s29, %s319_s20, %s806_s25, %s806_s25, %s807_s23   ;;  %v313_v8 = vld [vmem:[#allocation3 + $0x18] sm:$0xff] }
 0x1d5   : > { %314 = vst.msk [vmem:[%s980_s21] sm:$0xff] %vm271_vm1, %v310_v5  ;;  %315 = vst.msk [vmem:[%s980_s21 + $0x8] sm:$0xff] %vm271_vm1, %v311_v6  ;;  %s324_s24 = scalar_lea.sflag [#allocation9], %s975_s28  ;;  %s672_s30 = scalar_lea.vmem %s1015_s16, 512 }
 0x1d6   : > { %316 = vst.msk [vmem:[%s980_s21 + $0x10] sm:$0xff] %vm271_vm1, %v312_v7  ;;  %317 = vst.msk [vmem:[%s980_s21 + $0x18] sm:$0xff] %vm271_vm1, %v313_v8  ;;  %p673_p1 = scmp.ne.s32.totalorder %s1015_s16, %s672_s30  ;;  %s808_s7 = smov [#allocation8]  }
 0x1d7   : > { %s676_s29 = sshll.u32 %s808_s7, 4  ;;  %s677_s29 = int_to_ptr.vmem [resolvable:$false] %s676_s29 }
 0x1d8   : > { %p674_p5 = pnand %p673_p1, %p1127_p2  ;;  %s678_s20 = scalar_lea.vmem %s677_s29, 1024 }
 0x1d9   : > { %p679_p3 = scmp.lt.s32.totalorder %s1015_s16, %s677_s29  ;;  %p680_p10 = scmp.lt.s32.totalorder %s678_s20, %s672_s30 }
 0x1da   : > { %p675_p8 = pneg %p674_p5 }
 0x1db   : > { %p681_p11 = por %p680_p10, %p679_p3 }
 0x1dd   : > { %p682_p6 = pnand %p681_p11, %p675_p8 }
 0x1df   : > { %685 = shalt.err (!%p682_p6)
}
 0x1e0   : > { %s686_s21 = scalar_lea.hbm %s1013_s12, 512  ;;  %s690_s15 = scalar_lea.hbm %s1118_s2, 1024 }
 0x1e1   : > { %p687_p9 = scmp.ne.s32.totalorder %s1013_s12, %s686_s21  ;;  %p691_p12 = scmp.lt.u32.totalorder %s1013_s12, %s1118_s2 }
 0x1e2   : > { %p692_p4 = scmp.lt.u32.totalorder %s690_s15, %s686_s21  ;;  %p694_p1 = scmp.lt.u32.totalorder %s686_s21, %s1013_s12 }
 0x1e3   : > { %p688_p13 = pnand %p687_p9, %p1127_p2 }
 0x1e4   : > { %p693_p0 = por %p692_p4, %p691_p12 }
 0x1e5   : > { %p689_p7 = pneg %p688_p13 }
 0x1e6   : > { %p695_p5 = por %p694_p1, %p693_p0 }
 0x1e8   : > { %p696_p8 = pnand %p695_p5, %p689_p7 }
 0x1ea   : > { %699 = shalt.err (!%p696_p8)
}
 0x1eb   : > { %502 = dma.vmem_to_hbm [thread:$0]  (%p1127_p2), %s1015_s16, 512, %s1013_s12, %s324_s24, %s806_s25, %s806_s25, %s807_s23  }
 0x1ec PF: > { %p517_p3 = scmp.ge.s32.totalorder %s798_s19, 2  ;;  %s368_s30 = sand.u32 1, %s758_s9  }
 0x1ed   : > { %p1128_p10 = scmp.ne.s32.totalorder %s1125_s6, 0  ;;  %s369_s29 = scalar_lea.sflag [#allocation6], %s368_s30 }
 0x1ef   : > { %p510_p11 = pnand %p517_p3, %p1128_p10 }
 0x1f1   : > { %749 = dma.done.wait (!%p510_p11), %s369_s29, 512  }
 0x1f2   : > { %751 = vsyncadd (!%p510_p11), %s369_s29, 4294966784  ;;  %s378_s3 = scalar_lea.sflag [#allocation9], %s368_s30 }
 0x1f3   : > { %753 = dma.done.wait (!%p510_p11), %s378_s3, 512  }
 0x1f4   : > { %755 = vsyncadd (!%p510_p11), %s378_s3, 4294966784  ;;  %s22_s19 = sadd.s32 1, %s798_s19   ;;  %s1129_s6 = sld [smem:[#allocation13_spill]] }
 0x1f5   : > { %p19_p6 = scmp.ge.s32.totalorder %s22_s19, 6   ;;  %s1130_s9 = smov %s762_s10 }
 0x1f6   : > { %s1131_s10 = smov %s766_s11  ;;  %s1132_s11 = smov %s911_s4 }
 0x1f7   : > { %s1133_s12 = smov %s774_s13  ;;  %s1134_s13 = smov %s778_s14 }
 0x1f8   : > { %s1135_s14 = smov %s914_s5  ;;  %s1136_s15 = smov %s790_s17 }
 0x1f9   : > { %s1137_s16 = smov %s794_s18  ;;  %s1138_s17 = smov %s1141_s22 }
 0x1fa   : > { %s1139_s18 = smov %s1129_s6  ;;  %21 = sbr.rel (!%p19_p6) target bundleno = 11 (0xb), region = 90 }
 0x201   :  { %383 = vsyncpa [#allocation5], 1 }
 0x202   :  { %385 = vsyncpa [#allocation5 + $0x1], 1 }
 0x203   :  { %386 = vsyncpa [#allocation6], 1 }
 0x204   :  { %388 = vsyncpa [#allocation6 + $0x1], 1 }
 0x205   :  { %389 = vsyncpa [#allocation9], 1 }
 0x206   :  { %391 = vsyncpa [#allocation9 + $0x1], 1 }

</bundles_post_ra>
